<compile_context>
chip_gen: v7x
topology: tpu7x:2x2x1
jax: 0.10.0
libtpu: 0.0.40
codegen_flags: <defaults>
</compile_context>

<pallas_src>
import functools

import jax
import jax.numpy as jnp
from jax.experimental import pallas as pl
from jax.experimental.pallas import tpu as pltpu

_LANE = 128
_CHUNK_TARGET = 64 * 1024          # 65536 elems/channel/step: lane-dense, ~roofline-sized tile
_MAX_BLOCK_BYTES = 8 * 1024 * 1024  # per-step input block cap (double-buffered stays << 32 MiB)


def _color_constancy_kernel(x_ref, o_ref, acc_ref, *, inv_hw):
    # x_ref: (Bt, 3, CHUNK) tile; o_ref: (Bt, 1, 1, 1); acc_ref: (Bt, 3) f32 scratch.
    k = pl.program_id(1)

    @pl.when(k == 0)
    def _init():
        acc_ref[...] = jnp.zeros_like(acc_ref)

    # Single fused lane reduction over the chunk; accumulate per-channel sums in f32.
    x = x_ref[...].astype(jnp.float32)           # (Bt, 3, CHUNK)
    acc_ref[...] += jnp.sum(x, axis=-1)          # (Bt, 3)

    @pl.when(k == pl.num_programs(1) - 1)
    def _finalize():
        m = acc_ref[...] * jnp.float32(inv_hw)   # per-channel spatial means, (Bt, 3)
        mr = m[:, 0:1]
        mg = m[:, 1:2]
        mb = m[:, 2:3]
        drg = (mr - mg) ** 2
        drb = (mr - mb) ** 2
        dgb = (mb - mg) ** 2
        kv = jnp.sqrt(drg * drg + drb * drb + dgb * dgb + jnp.float32(1e-5))  # (Bt, 1)
        o_ref[...] = kv.reshape(o_ref.shape).astype(o_ref.dtype)


def _round_up(a, b):
    return -(-a // b) * b


def color_constancy_loss(x):
    """x: (B, 3, H, W) float32/bfloat16 NCHW. Returns (B, 1, 1, 1) in x.dtype."""
    B, C, H, W = x.shape
    assert C == 3, "ColorConstancyLoss expects 3 channels (RGB)"
    hw = H * W
    itemsize = jnp.dtype(x.dtype).itemsize

    # Flatten spatial dims -> lane-dense reduced axis; pad with zeros to a chunk multiple.
    x2 = x.reshape(B, C, hw)
    hw128 = _round_up(hw, _LANE)
    chunk = hw128 if hw128 <= _CHUNK_TARGET else _CHUNK_TARGET
    hw_pad = _round_up(hw, chunk)
    nk = hw_pad // chunk
    if hw_pad != hw:
        x2 = jnp.pad(x2, ((0, 0), (0, 0), (0, hw_pad - hw)))  # zeros: sums unchanged

    # Pack small images along batch per step (amortize ~0.35us/step), but keep >=2 programs
    # on the parallel batch axis when B >= 2 so both v7x TensorCores are fed.
    per_img_bytes = C * chunk * itemsize
    bt_cap = max(1, min(B if B == 1 else B // 2, _MAX_BLOCK_BYTES // per_img_bytes))
    bt = 1
    for cand in range(min(bt_cap, B), 0, -1):
        if B % cand == 0:
            bt = cand
            break
    nb = B // bt

    cost = pl.CostEstimate(
        flops=3 * B * hw + 32 * B,
        transcendentals=B,
        bytes_accessed=B * C * hw_pad * itemsize + B * itemsize,
    )

    return pl.pallas_call(
        functools.partial(_color_constancy_kernel, inv_hw=1.0 / hw),
        out_shape=jax.ShapeDtypeStruct((B, 1, 1, 1), x.dtype),
        grid_spec=pltpu.PrefetchScalarGridSpec(
            num_scalar_prefetch=0,
            grid=(nb, nk),
            in_specs=[pl.BlockSpec((bt, C, chunk), lambda i, k: (i, 0, k))],
            out_specs=pl.BlockSpec((bt, 1, 1, 1), lambda i, k: (i, 0, 0, 0)),
            scratch_shapes=[pltpu.VMEM((bt, 3), jnp.float32)],
        ),
        compiler_params=pltpu.CompilerParams(
            dimension_semantics=("parallel", "arbitrary"),
        ),
        cost_estimate=cost,
    )(x2)


def _reference(x):
    mean_rgb = jnp.mean(x.astype(jnp.float32), axis=(2, 3), keepdims=True)  # (B,3,1,1)
    mr = mean_rgb[:, 0:1]
    mg = mean_rgb[:, 1:2]
    mb = mean_rgb[:, 2:3]
    drg = (mr - mg) ** 2
    drb = (mr - mb) ** 2
    dgb = (mb - mg) ** 2
    return jnp.sqrt(drg ** 2 + drb ** 2 + dgb ** 2 + 1e-5).astype(x.dtype)


if __name__ == "__main__":
    key = jax.random.PRNGKey(0)
    # main small case + odd spatial (padding path) + multi-chunk (accumulator path)
    cases = [(2, 3, 16, 16), (2, 3, 17, 23), (1, 3, 300, 300)]
    for shape in cases:
        key, sub = jax.random.split(key)
        x = jax.random.uniform(sub, shape, dtype=jnp.float32)
        out = jax.block_until_ready(color_constancy_loss(x))
        ref = _reference(x)
        assert out.shape == (shape[0], 1, 1, 1), (shape, out.shape)
        assert jnp.allclose(out, ref, atol=1e-5, rtol=1e-5), (shape, out, ref)
    print("KERNEL_OK")
</pallas_src>

<mosaic_0001>
module attributes {stable_mosaic.version = 11 : i64} {
  func.func @_color_constancy_kernel(%arg0: i32, %arg1: i32, %arg2: memref<1x3x256xf32, #tpu.memory_space<vmem>>, %arg3: memref<1x1x1x1xf32, #tpu.memory_space<vmem>>, %arg4: memref<1x3xf32, #tpu.memory_space<vmem>>) attributes {dimension_semantics = [#tpu.dimension_semantics<parallel>, #tpu.dimension_semantics<arbitrary>], iteration_bounds = array<i64: 2, 1>, scalar_prefetch = 0 : i64, scratch_operands = 1 : i64, tpu.core_type = #tpu.core_type<tc>, window_params = [{transform_indices = @transform_0, window_bounds = array<i64: 1, 3, 256>}, {transform_indices = @transform_1, window_bounds = array<i64: 1, 1, 1, 1>}]} {
    %c0_i32 = arith.constant 0 : i32
    %0 = arith.cmpi eq, %arg1, %c0_i32 : i32
    %1 = arith.extui %0 : i1 to i32
    %c0_i32_0 = arith.constant 0 : i32
    %2 = arith.cmpi ne, %1, %c0_i32_0 : i32
    scf.if %2 {
      %cst_9 = arith.constant 0.000000e+00 : f32
      %11 = vector.broadcast %cst_9 : f32 to vector<1x3xf32>
      %c0_10 = arith.constant 0 : index
      %c0_11 = arith.constant 0 : index
      %12 = vector.load %arg4[%c0_10, %c0_11] : memref<1x3xf32, #tpu.memory_space<vmem>>, vector<1x3xf32>
      tpu.vector_store %arg4[%c0_10, %c0_11], %11 {strides = array<i32>} : memref<1x3xf32, #tpu.memory_space<vmem>>, vector<1x3xf32>,
    } else {
    }
    %c0 = arith.constant 0 : index
    %c0_1 = arith.constant 0 : index
    %c0_2 = arith.constant 0 : index
    %3 = vector.load %arg2[%c0, %c0_1, %c0_2] : memref<1x3x256xf32, #tpu.memory_space<vmem>>, vector<1x3x256xf32>
    %c0_3 = arith.constant 0 : index
    %c0_4 = arith.constant 0 : index
    %4 = vector.load %arg4[%c0_3, %c0_4] : memref<1x3xf32, #tpu.memory_space<vmem>>, vector<1x3xf32>
    %cst = arith.constant dense<0.000000e+00> : vector<1x3xf32>
    %5 = vector.multi_reduction <add>, %3, %cst [2] : vector<1x3x256xf32> to vector<1x3xf32>
    %6 = arith.addf %4, %5 : vector<1x3xf32>
    %c0_5 = arith.constant 0 : index
    %c0_6 = arith.constant 0 : index
    %7 = vector.load %arg4[%c0_5, %c0_6] : memref<1x3xf32, #tpu.memory_space<vmem>>, vector<1x3xf32>
    tpu.vector_store %arg4[%c0_5, %c0_6], %6 {strides = array<i32>} : memref<1x3xf32, #tpu.memory_space<vmem>>, vector<1x3xf32>,
    %c0_i32_7 = arith.constant 0 : i32
    %8 = arith.cmpi eq, %arg1, %c0_i32_7 : i32
    %9 = arith.extui %8 : i1 to i32
    %c0_i32_8 = arith.constant 0 : i32
    %10 = arith.cmpi ne, %9, %c0_i32_8 : i32
    scf.if %10 {
      %c0_9 = arith.constant 0 : index
      %c0_10 = arith.constant 0 : index
      %11 = vector.load %arg4[%c0_9, %c0_10] : memref<1x3xf32, #tpu.memory_space<vmem>>, vector<1x3xf32>
      %cst_11 = arith.constant 3.906250e-03 : f32
      %12 = vector.broadcast %cst_11 : f32 to vector<1x3xf32>
      %13 = arith.mulf %11, %12 : vector<1x3xf32>
      %14 = vector.extract_strided_slice %13 {offsets = [0, 0], sizes = [1, 1], strides = [1, 1]} : vector<1x3xf32> to vector<1x1xf32>
      %15 = vector.extract_strided_slice %13 {offsets = [0, 1], sizes = [1, 1], strides = [1, 1]} : vector<1x3xf32> to vector<1x1xf32>
      %16 = vector.extract_strided_slice %13 {offsets = [0, 2], sizes = [1, 1], strides = [1, 1]} : vector<1x3xf32> to vector<1x1xf32>
      %17 = arith.subf %14, %15 : vector<1x1xf32>
      %18 = arith.mulf %17, %17 : vector<1x1xf32>
      %19 = arith.subf %14, %16 : vector<1x1xf32>
      %20 = arith.mulf %19, %19 : vector<1x1xf32>
      %21 = arith.subf %16, %15 : vector<1x1xf32>
      %22 = arith.mulf %21, %21 : vector<1x1xf32>
      %23 = arith.mulf %18, %18 : vector<1x1xf32>
      %24 = arith.mulf %20, %20 : vector<1x1xf32>
      %25 = arith.addf %23, %24 : vector<1x1xf32>
      %26 = arith.mulf %22, %22 : vector<1x1xf32>
      %27 = arith.addf %25, %26 : vector<1x1xf32>
      %cst_12 = arith.constant 9.99999974E-6 : f32
      %28 = vector.broadcast %cst_12 : f32 to vector<1x1xf32>
      %29 = arith.addf %27, %28 : vector<1x1xf32>
      %30 = math.sqrt %29 : vector<1x1xf32>
      %31 = vector.shape_cast %30 : vector<1x1xf32> to vector<1x1x1x1xf32>
      %c0_13 = arith.constant 0 : index
      %c0_14 = arith.constant 0 : index
      %c0_15 = arith.constant 0 : index
      %c0_16 = arith.constant 0 : index
      %32 = vector.load %arg3[%c0_13, %c0_14, %c0_15, %c0_16] : memref<1x1x1x1xf32, #tpu.memory_space<vmem>>, vector<1x1x1x1xf32>
      tpu.vector_store %arg3[%c0_13, %c0_14, %c0_15, %c0_16], %31 {strides = array<i32>} : memref<1x1x1x1xf32, #tpu.memory_space<vmem>>, vector<1x1x1x1xf32>,
    } else {
    }
    return
  }
  func.func @transform_0(%arg0: i32, %arg1: i32) -> (i32, i32, i32) {
    %c0_i32 = arith.constant 0 : i32
    %c0_i32_0 = arith.constant 0 : i32
    return %arg0, %c0_i32, %arg1 : i32, i32, i32
  }
  func.func @transform_1(%arg0: i32, %arg1: i32) -> (i32, i32, i32, i32) {
    %c0_i32 = arith.constant 0 : i32
    %c0_i32_0 = arith.constant 0 : i32
    %c0_i32_1 = arith.constant 0 : i32
    %c0_i32_2 = arith.constant 0 : i32
    return %arg0, %c0_i32, %c0_i32_0, %c0_i32_1 : i32, i32, i32, i32
  }
}

</mosaic_0001>

<bundles_post_ra>
// kernel: tpu_custom_call.1
= control target key start
LH: loop header
LB: loop body
LE: loop exit
PB: predicated region body
PF: predicated region fallthrough
CT: control target
= control target key end

     0   :  { %s406_s6 = smov 0   ;;  %s408_s7 = smov 0   ;;  %s445_s0 = inlined_call_operand.vmem [shape: f32[2,3,256], index: 0, kind: input, shape index: {}]   ;;  %s446_s1 = inlined_call_operand.vmem [shape: f32[2,1,1,1], index: 1, kind: output, shape index: {}]  }
   0x1   :  { %s410_s8 = smov 0  }
   0x2 LB: > { %s23_s9 = sadd.s32 1, %s384_s7  ;;  %p326_p0 = scmp.ge.s32.totalorder %s388_s8, 1  ;;  %s388_s8 = sphi %s410_s8, %s11_s8   ;;  %s384_s7 = sphi %s408_s7, %s448_s7   ;;  %s380_s6 = sphi %s406_s6, %s447_s6  }
   0x3   : > { %p25_p1 = scmp.ge.s32.totalorder %s23_s9, 2  ;;  %p106_p2 = scmp.lt.s32.totalorder %s388_s8, 3 }
   0x5   : > { %s450_s9 = smov (%p25_p1, %s23_s9), 0  ;;  %p107_p3 = pnand %p326_p0, %p106_p2 }
   0x6   : > { %p129_p4 = scmp.lt.s32.totalorder (!%p107_p3), %s380_s6, 1  ;;  %vm152_vm0 = vcmask (!%p107_p3), 1042432   ;;  %v390_v5 = vmov (!%p107_p3), 0   ;;  %v159_v6 = vlaneseq (!%p107_p3)  ;;  %vm145_vm1 = vcmask (!%p107_p3), 16384   ;;  %s393_s14 = smov (!%p107_p3), 1  }
   0x7   : > { %110 = sbr.rel (%p107_p3) target bundleno = 577 (0x241), region = 24  ;;  %362 = vset.pattern.permute.xlu0 (!%p107_p3), %v390_v5  ;;  %v391_v9 = vmov (!%p107_p3), 0.0   ;;  %v392_v11 = vmov (!%p107_p3), 1966171168   ;;  %s394_s15 = smov (!%p107_p3), 127   ;;  %vm259_vm2 = vcmask (!%p107_p3), 0  }
   0x8   : > { %v160_v7 = vshrl.u32 (!%p107_p3), %v159_v6, 7  ;;  %v198_v8 = vand.u32 (!%p107_p3), 127, %v159_v6  ;;  %146 = vst.msk [vmem:[#allocation2] sm:$0x1] (!%p107_p3), %vm145_vm1, %v391_v9  ;;  %v173_v12 = vunpack.c.l.s4 (!%p107_p3), %v392_v11  ;;  %s395_s16 = smov (!%p107_p3), 126  }
   0xa   : > { %v201_v10 = vsub.s32 (!%p107_p3), %v198_v8, %v160_v7  ;;  %v161_v13 = vsub.s32 (!%p107_p3), 0, %v160_v7  ;;  %v165_v14 = vsub.s32 (!%p107_p3), 1, %v160_v7  ;;  %v169_v15 = vsub.s32 (!%p107_p3), 2, %v160_v7 }
   0xb   : > { %v174_v16 = vunpack.c.0.s8 (!%p107_p3), %v173_v12 }
   0xd   : > { %v177_v18 = vsub.s32 (!%p107_p3), %v174_v16, %v160_v7 }
   0xe   : > { %s452_s6 = smov (!%p129_p4, %s380_s6), 1 }
   0xf   : > { %s331_s10 = sshll.u32 %s452_s6, 3  ;;  %v148_v30 = vld [vmem:[#allocation2] sm:$0x1]  ;;  %s140_s19 = scalar_lea.vmem %s446_s1, %s452_s6 }
  0x10   : > { %s136_s13 = scalar_lea.vmem %s445_s0, %s331_s10 }
  0x11   : > { %v147_v0 = vld [vmem:[%s136_s13] sm:$0x77] }
  0x12   : > { %v150_v1 = vcombine.high %v147_v0, %v147_v0  ;;  %v153_v2 = vsel %vm152_vm0, %v147_v0, 0.0 }
  0x14   : > { %v154_v3 = vsel %vm152_vm0, %v150_v1, 0.0 }
  0x15   : > { %v155_v4 = vadd.f32 %v154_v3, %v153_v2 }
  0x17   : > { %156 = vadd.xlane.f32.xlu0 %v155_v4 }
  0xa4   : > { %v157_v17 = vpop.xlane.xlu0 %156 }
  0xa5   : > { %v162_v19 = vrot.slane %v157_v17, %v161_v13  ;;  %v166_v20 = vrot.slane %v157_v17, %v165_v14  ;;  %v170_v21 = vrot.slane %v157_v17, %v169_v15 }
  0xa7   : > { %v171_v22 = vcombine.low %v162_v19, %v166_v20  ;;  %v185_v24 = vrot.slane %v170_v21, %v177_v18 }
  0xa9   : > { %v178_v23 = vrot.slane %v171_v22, %v177_v18 }
  0xab   : > { %v186_v25 = vcombine.low %v178_v23, %v185_v24 }
  0xad   : > { %v193_v26 = vrot.slane %v186_v25, %v177_v18 }
  0xaf   : > { %195 = vperm.xlu0 %362, %v193_v26  }
 0x12e   : > { %v196_v27 = vpop.permute.xlu0 %195 }
 0x12f   : > { %v202_v28 = vrot.slane %v196_v27, %v201_v10 }
 0x131   : > { %v209_v29 = vrot.slane %v202_v28, %v177_v18 }
 0x133   : > { %v216_v31 = vrot.slane %v209_v29, %v177_v18 }
 0x135   : > { %v218_v32 = vadd.f32 %v216_v31, %v148_v30 }
 0x137   : > { %220 = vst.msk [vmem:[#allocation2] sm:$0x1] %vm145_vm1, %v218_v32 }
 0x13e   : > { %v224_v33 = vld [vmem:[#allocation2] sm:$0x1] }
 0x13f   : > { %v225_v34 = vmul.f32 0.00390625, %v224_v33 }
 0x141   : > { %237 = vrot.lane.b32.xlu1 %v225_v34, %s393_s14 }
 0x145   : > { %227 = vrot.lane.b32.xlu1 %v225_v34, %s394_s15 }
 0x149   : > { %232 = vrot.lane.b32.xlu1 %v225_v34, %s395_s16 }
 0x1b3   : > { %v238_v35 = vpop.permute.xlu1 %237 }
 0x1b4   : > { %v240_v36 = vsub.f32 %v225_v34, %v238_v35 }
 0x1b6   : > { %v241_v37 = vmul.f32 %v240_v36, %v240_v36 }
 0x1b7   : > { %v228_v39 = vpop.permute.xlu1 %227 }
 0x1b8   : > { %v245_v38 = vmul.f32 %v241_v37, %v241_v37  ;;  %v230_v42 = vsub.f32 %v225_v34, %v228_v39 }
 0x1ba   : > { %247 = vrot.lane.b32.xlu1 %v245_v38, %s395_s16  ;;  %v231_v44 = vmul.f32 %v230_v42, %v230_v42 }
 0x1bb   : > { %v233_v40 = vpop.permute.xlu1 %232 }
 0x1bc   : > { %v235_v41 = vsub.f32 %v225_v34, %v233_v40  ;;  %v242_v46 = vmul.f32 %v231_v44, %v231_v44 }
 0x1be   : > { %v236_v43 = vmul.f32 %v235_v41, %v235_v41 }
 0x1c0   : > { %v243_v45 = vmul.f32 %v236_v43, %v236_v43 }
 0x1c2   : > { %v244_v47 = vadd.f32 %v243_v45, %v242_v46 }
 0x22c   : > { %v248_v48 = vpop.permute.xlu1 %247 }
 0x22d   : > { %v250_v49 = vadd.f32 %v248_v48, %v244_v47 }
 0x22f   : > { %v251_v50 = vadd.f32 1e-05, %v250_v49 }
 0x231   : > { %364 = vrsqrt.f32 %v251_v50  ;;  %vm254_vm3 = vcmp.eq.f32.partialorder %v251_v50, inf  ;;  %v257_v53 = vand.u32 2147483648, %v251_v50  ;;  %vm256_vm4 = vcmp.eq.f32.partialorder %v251_v50, 0.0 }
 0x23b   : > { %v365_v51 = vpop.eup %364 }
 0x23c   : > { %v253_v52 = vmul.f32 %v365_v51, %v251_v50 }
 0x23e   : > { %v255_v54 = vsel %vm254_vm3, %v251_v50, %v253_v52 }
 0x23f   : > { %v258_v55 = vsel %vm256_vm4, %v257_v53, %v255_v54 }
 0x240   : > { %260 = vst.msk [vmem:[%s140_s19] sm:$0x1] %vm259_vm2, %v258_v55 }
 0x241 PF: > { %s11_s8 = sadd.s32 1, %s388_s8   ;;  %s447_s6 = smov %s384_s7 }
 0x242   : > { %p8_p5 = scmp.ge.s32.totalorder %s11_s8, 4   ;;  %s448_s7 = smov %s450_s9 }
 0x244   :  { %10 = sbr.rel (!%p8_p5) target bundleno = 2 (0x2), region = 62 }

</bundles_post_ra>
